<compile_context>
chip_gen: v7x
topology: tpu7x:2x2x1
jax: 0.10.0
libtpu: 0.0.40
codegen_flags: <defaults>
</compile_context>

<pallas_src>
import functools

import jax
import jax.numpy as jnp
from jax.experimental import pallas as pl
from jax.experimental.pallas import tpu as pltpu

EPS = 1e-5
_CAP_S = 128           # max sublane rows per block (block <= C*128*128*4 B)
_VMEM_LIMIT = 32 * 1024 * 1024   # safe on v5e / v6e / v7x


def _reduce_kernel(x_ref, sum_ref, sq_ref, *, num_channels, tile_s, s_total,
                   need_mask):
    """Accumulate per-channel lane-partial sum / sum-of-squares.

    x_ref:   (1, C, TILE_S, LANES) block of the (N, C, S, LANES) view.
    sum_ref: (C, LANES) resident accumulator (constant output block index).
    sq_ref:  (C, LANES) resident accumulator.
    """
    @pl.when(jnp.logical_and(pl.program_id(0) == 0, pl.program_id(1) == 0))
    def _init():
        sum_ref[...] = jnp.zeros_like(sum_ref)
        sq_ref[...] = jnp.zeros_like(sq_ref)

    if need_mask:
        # Last s-tile may overhang S; zero out the out-of-bounds sublane rows
        # so garbage in the padded block region never contaminates the sums.
        s_idx = pl.program_id(1)
        lanes = x_ref.shape[-1]
        row = jax.lax.broadcasted_iota(jnp.int32, (tile_s, lanes), 0)
        valid = (row + s_idx * tile_s) < s_total

    # Per-channel loop keeps the live set to one (TILE_S, LANES) slab -> no
    # register spills even at the largest tile.
    for c in range(num_channels):
        xc = x_ref[0, c, :, :]                       # (TILE_S, LANES) f32
        if need_mask:
            xc = jnp.where(valid, xc, 0.0)
        sum_ref[pl.ds(c, 1), :] += jnp.sum(xc, axis=0, keepdims=True)
        sq_ref[pl.ds(c, 1), :] += jnp.sum(xc * xc, axis=0, keepdims=True)


def _normalize_kernel(scale_ref, shift_ref, x_ref, o_ref, *, num_channels):
    """o = x * scale[c] + shift[c]  (fused per-channel scale/shift FMA).

    scale_ref / shift_ref: (C,) f32 in SMEM (scalar reads, no VMEM tile).
    x_ref / o_ref:         (1, C, TILE_S, LANES) blocks.
    """
    for c in range(num_channels):
        o_ref[0, c, :, :] = x_ref[0, c, :, :] * scale_ref[c] + shift_ref[c]


@jax.jit
def batchnorm3d(x, weight, bias):
    """Training-mode BatchNorm3d: batch statistics, biased variance, eps=1e-5, affine.

    x: (N, C, D, H, W) float32; weight/bias: (C,) float32.
    """
    N, C, D, H, W = x.shape
    M = D * H * W
    x = x.astype(jnp.float32)

    # Free re-view of the contiguous NCDHW buffer (no transpose, no copy):
    # (N, C, D, H, W) -> (N, C, S, LANES) with lane dim a multiple of 128 when
    # possible so vregs and stores are fully lane-dense.
    lanes = 128 if M % 128 == 0 else M
    S = M // lanes
    tile_s = S if S <= _CAP_S else _CAP_S            # full dim, or multiple of 8
    s_tiles = pl.cdiv(S, tile_s)
    need_mask = (S % tile_s) != 0

    x4 = x.reshape(N, C, S, lanes)

    # ---- Pass 1: per-channel sum / sum-of-squares (accumulate-then-finalize) ----
    sum_pl, sq_pl = pl.pallas_call(
        functools.partial(_reduce_kernel, num_channels=C, tile_s=tile_s,
                          s_total=S, need_mask=need_mask),
        out_shape=(jax.ShapeDtypeStruct((C, lanes), jnp.float32),
                   jax.ShapeDtypeStruct((C, lanes), jnp.float32)),
        grid=(N, s_tiles),
        in_specs=[pl.BlockSpec((1, C, tile_s, lanes), lambda n, s: (n, 0, s, 0))],
        out_specs=(pl.BlockSpec((C, lanes), lambda n, s: (0, 0)),
                   pl.BlockSpec((C, lanes), lambda n, s: (0, 0))),
        compiler_params=pltpu.CompilerParams(
            dimension_semantics=("arbitrary", "arbitrary"),
            vmem_limit_bytes=_VMEM_LIMIT),
    )(x4)

    # Tiny (C,)-sized finalize in plain JAX: mean, biased var, fused scale/shift.
    count = jnp.float32(N * M)
    mean = jnp.sum(sum_pl, axis=-1) / count                         # (C,)
    # E[x^2] - mean^2 (biased); clamp tiny negative values from cancellation.
    var = jnp.maximum(jnp.sum(sq_pl, axis=-1) / count - mean * mean, 0.0)
    scale = weight.astype(jnp.float32) * jax.lax.rsqrt(var + EPS)   # (C,)
    shift = bias.astype(jnp.float32) - mean * scale                 # (C,)

    # ---- Pass 2: elementwise normalize sweep (x * scale + shift) ----
    out4 = pl.pallas_call(
        functools.partial(_normalize_kernel, num_channels=C),
        out_shape=jax.ShapeDtypeStruct((N, C, S, lanes), jnp.float32),
        grid=(N, s_tiles),
        in_specs=[
            pl.BlockSpec(memory_space=pltpu.MemorySpace.SMEM),   # scale (C,)
            pl.BlockSpec(memory_space=pltpu.MemorySpace.SMEM),   # shift (C,)
            pl.BlockSpec((1, C, tile_s, lanes), lambda n, s: (n, 0, s, 0)),
        ],
        out_specs=pl.BlockSpec((1, C, tile_s, lanes), lambda n, s: (n, 0, s, 0)),
        compiler_params=pltpu.CompilerParams(
            dimension_semantics=("parallel", "parallel"),
            vmem_limit_bytes=_VMEM_LIMIT),
    )(scale, shift, x4)

    # Free re-view back to NCDHW.
    return out4.reshape(N, C, D, H, W)


def _reference(x, weight, bias):
    mean = jnp.mean(x, axis=(0, 2, 3, 4), keepdims=True)
    var = jnp.mean((x - mean) ** 2, axis=(0, 2, 3, 4), keepdims=True)
    w = weight.reshape(1, -1, 1, 1, 1)
    b = bias.reshape(1, -1, 1, 1, 1)
    return (x - mean) / jnp.sqrt(var + EPS) * w + b


if __name__ == "__main__":
    key = jax.random.PRNGKey(0)
    kx, kw, kb = jax.random.split(key, 3)

    # BatchNorm3d(3) => input (N, C=3, D, H, W)
    x = jax.random.normal(kx, (2, 3, 4, 8, 8), dtype=jnp.float32)
    weight = jax.random.normal(kw, (3,), dtype=jnp.float32)
    bias = jax.random.normal(kb, (3,), dtype=jnp.float32)

    out = batchnorm3d(x, weight, bias)
    out = jax.block_until_ready(out)

    ref = _reference(x, weight, bias)
    assert out.shape == x.shape
    assert jnp.allclose(out, ref, atol=1e-4, rtol=1e-4), "mismatch vs reference"

    print("KERNEL_OK")
</pallas_src>

<mosaic_0001>
module attributes {stable_mosaic.version = 11 : i64} {
  func.func @_reduce_kernel(%arg0: i32, %arg1: i32, %arg2: memref<1x3x2x128xf32, #tpu.memory_space<vmem>>, %arg3: memref<3x128xf32, #tpu.memory_space<vmem>>, %arg4: memref<3x128xf32, #tpu.memory_space<vmem>>) attributes {dimension_semantics = [#tpu.dimension_semantics<arbitrary>, #tpu.dimension_semantics<arbitrary>], iteration_bounds = array<i64: 2, 1>, scalar_prefetch = 0 : i64, scratch_operands = 0 : i64, tpu.core_type = #tpu.core_type<tc>, window_params = [{transform_indices = @transform_0, window_bounds = array<i64: 1, 3, 2, 128>}, {pipeline_mode = #tpu.pipeline_mode<synchronous>, transform_indices = @transform_1, window_bounds = array<i64: 3, 128>}, {pipeline_mode = #tpu.pipeline_mode<synchronous>, transform_indices = @transform_2, window_bounds = array<i64: 3, 128>}]} {
    %c0_i32 = arith.constant 0 : i32
    %0 = arith.cmpi eq, %arg0, %c0_i32 : i32
    %c0_i32_0 = arith.constant 0 : i32
    %1 = arith.cmpi eq, %arg1, %c0_i32_0 : i32
    %2 = arith.andi %0, %1 : i1
    %3 = arith.extui %2 : i1 to i32
    %c0_i32_1 = arith.constant 0 : i32
    %4 = arith.cmpi ne, %3, %c0_i32_1 : i32
    scf.if %4 {
      %cst_40 = arith.constant 0.000000e+00 : f32
      %44 = vector.broadcast %cst_40 : f32 to vector<3x128xf32>
      %c0_41 = arith.constant 0 : index
      %c0_42 = arith.constant 0 : index
      %45 = vector.load %arg3[%c0_41, %c0_42] : memref<3x128xf32, #tpu.memory_space<vmem>>, vector<3x128xf32>
      tpu.vector_store %arg3[%c0_41, %c0_42], %44 {strides = array<i32>} : memref<3x128xf32, #tpu.memory_space<vmem>>, vector<3x128xf32>,
      %cst_43 = arith.constant 0.000000e+00 : f32
      %46 = vector.broadcast %cst_43 : f32 to vector<3x128xf32>
      %c0_44 = arith.constant 0 : index
      %c0_45 = arith.constant 0 : index
      %47 = vector.load %arg4[%c0_44, %c0_45] : memref<3x128xf32, #tpu.memory_space<vmem>>, vector<3x128xf32>
      tpu.vector_store %arg4[%c0_44, %c0_45], %46 {strides = array<i32>} : memref<3x128xf32, #tpu.memory_space<vmem>>, vector<3x128xf32>,
    } else {
    }
    %c0 = arith.constant 0 : index
    %c0_2 = arith.constant 0 : index
    %c0_3 = arith.constant 0 : index
    %c0_4 = arith.constant 0 : index
    %5 = vector.load %arg2[%c0, %c0_2, %c0_3, %c0_4] : memref<1x3x2x128xf32, #tpu.memory_space<vmem>>, vector<1x1x2x128xf32>
    %6 = vector.shape_cast %5 : vector<1x1x2x128xf32> to vector<2x128xf32>
    %c0_5 = arith.constant 0 : index
    %c0_6 = arith.constant 0 : index
    %7 = vector.load %arg3[%c0_5, %c0_6] : memref<3x128xf32, #tpu.memory_space<vmem>>, vector<1x128xf32>
    %cst = arith.constant dense<0.000000e+00> : vector<128xf32>
    %8 = vector.multi_reduction <add>, %6, %cst [0] : vector<2x128xf32> to vector<128xf32>
    %9 = vector.shape_cast %8 : vector<128xf32> to vector<1x128xf32>
    %10 = arith.addf %7, %9 : vector<1x128xf32>
    %c0_7 = arith.constant 0 : index
    %c0_8 = arith.constant 0 : index
    %11 = vector.load %arg3[%c0_7, %c0_8] : memref<3x128xf32, #tpu.memory_space<vmem>>, vector<1x128xf32>
    tpu.vector_store %arg3[%c0_7, %c0_8], %10 {strides = array<i32>} : memref<3x128xf32, #tpu.memory_space<vmem>>, vector<1x128xf32>,
    %c0_9 = arith.constant 0 : index
    %c0_10 = arith.constant 0 : index
    %12 = vector.load %arg4[%c0_9, %c0_10] : memref<3x128xf32, #tpu.memory_space<vmem>>, vector<1x128xf32>
    %13 = arith.mulf %6, %6 : vector<2x128xf32>
    %cst_11 = arith.constant dense<0.000000e+00> : vector<128xf32>
    %14 = vector.multi_reduction <add>, %13, %cst_11 [0] : vector<2x128xf32> to vector<128xf32>
    %15 = vector.shape_cast %14 : vector<128xf32> to vector<1x128xf32>
    %16 = arith.addf %12, %15 : vector<1x128xf32>
    %c0_12 = arith.constant 0 : index
    %c0_13 = arith.constant 0 : index
    %17 = vector.load %arg4[%c0_12, %c0_13] : memref<3x128xf32, #tpu.memory_space<vmem>>, vector<1x128xf32>
    tpu.vector_store %arg4[%c0_12, %c0_13], %16 {strides = array<i32>} : memref<3x128xf32, #tpu.memory_space<vmem>>, vector<1x128xf32>,
    %c0_14 = arith.constant 0 : index
    %c1 = arith.constant 1 : index
    %c0_15 = arith.constant 0 : index
    %c0_16 = arith.constant 0 : index
    %18 = vector.load %arg2[%c0_14, %c1, %c0_15, %c0_16] : memref<1x3x2x128xf32, #tpu.memory_space<vmem>>, vector<1x1x2x128xf32>
    %19 = vector.shape_cast %18 : vector<1x1x2x128xf32> to vector<2x128xf32>
    %c1_17 = arith.constant 1 : index
    %c0_18 = arith.constant 0 : index
    %20 = vector.load %arg3[%c1_17, %c0_18] : memref<3x128xf32, #tpu.memory_space<vmem>>, vector<1x128xf32>
    %cst_19 = arith.constant dense<0.000000e+00> : vector<128xf32>
    %21 = vector.multi_reduction <add>, %19, %cst_19 [0] : vector<2x128xf32> to vector<128xf32>
    %22 = vector.shape_cast %21 : vector<128xf32> to vector<1x128xf32>
    %23 = arith.addf %20, %22 : vector<1x128xf32>
    %c1_20 = arith.constant 1 : index
    %c0_21 = arith.constant 0 : index
    %24 = vector.load %arg3[%c1_20, %c0_21] : memref<3x128xf32, #tpu.memory_space<vmem>>, vector<1x128xf32>
    tpu.vector_store %arg3[%c1_20, %c0_21], %23 {strides = array<i32>} : memref<3x128xf32, #tpu.memory_space<vmem>>, vector<1x128xf32>,
    %c1_22 = arith.constant 1 : index
    %c0_23 = arith.constant 0 : index
    %25 = vector.load %arg4[%c1_22, %c0_23] : memref<3x128xf32, #tpu.memory_space<vmem>>, vector<1x128xf32>
    %26 = arith.mulf %19, %19 : vector<2x128xf32>
    %cst_24 = arith.constant dense<0.000000e+00> : vector<128xf32>
    %27 = vector.multi_reduction <add>, %26, %cst_24 [0] : vector<2x128xf32> to vector<128xf32>
    %28 = vector.shape_cast %27 : vector<128xf32> to vector<1x128xf32>
    %29 = arith.addf %25, %28 : vector<1x128xf32>
    %c1_25 = arith.constant 1 : index
    %c0_26 = arith.constant 0 : index
    %30 = vector.load %arg4[%c1_25, %c0_26] : memref<3x128xf32, #tpu.memory_space<vmem>>, vector<1x128xf32>
    tpu.vector_store %arg4[%c1_25, %c0_26], %29 {strides = array<i32>} : memref<3x128xf32, #tpu.memory_space<vmem>>, vector<1x128xf32>,
    %c0_27 = arith.constant 0 : index
    %c2 = arith.constant 2 : index
    %c0_28 = arith.constant 0 : index
    %c0_29 = arith.constant 0 : index
    %31 = vector.load %arg2[%c0_27, %c2, %c0_28, %c0_29] : memref<1x3x2x128xf32, #tpu.memory_space<vmem>>, vector<1x1x2x128xf32>
    %32 = vector.shape_cast %31 : vector<1x1x2x128xf32> to vector<2x128xf32>
    %c2_30 = arith.constant 2 : index
    %c0_31 = arith.constant 0 : index
    %33 = vector.load %arg3[%c2_30, %c0_31] : memref<3x128xf32, #tpu.memory_space<vmem>>, vector<1x128xf32>
    %cst_32 = arith.constant dense<0.000000e+00> : vector<128xf32>
    %34 = vector.multi_reduction <add>, %32, %cst_32 [0] : vector<2x128xf32> to vector<128xf32>
    %35 = vector.shape_cast %34 : vector<128xf32> to vector<1x128xf32>
    %36 = arith.addf %33, %35 : vector<1x128xf32>
    %c2_33 = arith.constant 2 : index
    %c0_34 = arith.constant 0 : index
    %37 = vector.load %arg3[%c2_33, %c0_34] : memref<3x128xf32, #tpu.memory_space<vmem>>, vector<1x128xf32>
    tpu.vector_store %arg3[%c2_33, %c0_34], %36 {strides = array<i32>} : memref<3x128xf32, #tpu.memory_space<vmem>>, vector<1x128xf32>,
    %c2_35 = arith.constant 2 : index
    %c0_36 = arith.constant 0 : index
    %38 = vector.load %arg4[%c2_35, %c0_36] : memref<3x128xf32, #tpu.memory_space<vmem>>, vector<1x128xf32>
    %39 = arith.mulf %32, %32 : vector<2x128xf32>
    %cst_37 = arith.constant dense<0.000000e+00> : vector<128xf32>
    %40 = vector.multi_reduction <add>, %39, %cst_37 [0] : vector<2x128xf32> to vector<128xf32>
    %41 = vector.shape_cast %40 : vector<128xf32> to vector<1x128xf32>
    %42 = arith.addf %38, %41 : vector<1x128xf32>
    %c2_38 = arith.constant 2 : index
    %c0_39 = arith.constant 0 : index
    %43 = vector.load %arg4[%c2_38, %c0_39] : memref<3x128xf32, #tpu.memory_space<vmem>>, vector<1x128xf32>
    tpu.vector_store %arg4[%c2_38, %c0_39], %42 {strides = array<i32>} : memref<3x128xf32, #tpu.memory_space<vmem>>, vector<1x128xf32>,
    return
  }
  func.func @transform_0(%arg0: i32, %arg1: i32) -> (i32, i32, i32, i32) {
    %c0_i32 = arith.constant 0 : i32
    %c0_i32_0 = arith.constant 0 : i32
    %c0_i32_1 = arith.constant 0 : i32
    return %arg0, %c0_i32, %arg1, %c0_i32_0 : i32, i32, i32, i32
  }
  func.func @transform_1(%arg0: i32, %arg1: i32) -> (i32, i32) {
    %c0_i32 = arith.constant 0 : i32
    %c0_i32_0 = arith.constant 0 : i32
    %c0_i32_1 = arith.constant 0 : i32
    return %c0_i32, %c0_i32_0 : i32, i32
  }
  func.func @transform_2(%arg0: i32, %arg1: i32) -> (i32, i32) {
    %c0_i32 = arith.constant 0 : i32
    %c0_i32_0 = arith.constant 0 : i32
    %c0_i32_1 = arith.constant 0 : i32
    return %c0_i32, %c0_i32_0 : i32, i32
  }
}

module attributes {stable_mosaic.version = 11 : i64} {
  func.func @_normalize_kernel(%arg0: i32, %arg1: i32, %arg2: memref<3xf32, #tpu.memory_space<smem>>, %arg3: memref<3xf32, #tpu.memory_space<smem>>, %arg4: memref<1x3x2x128xf32, #tpu.memory_space<vmem>>, %arg5: memref<1x3x2x128xf32, #tpu.memory_space<vmem>>) attributes {dimension_semantics = [#tpu.dimension_semantics<parallel>, #tpu.dimension_semantics<parallel>], iteration_bounds = array<i64: 2, 1>, scalar_prefetch = 0 : i64, scratch_operands = 0 : i64, tpu.core_type = #tpu.core_type<tc>, window_params = [{transform_indices = @transform_0, window_bounds = array<i64: 3>}, {transform_indices = @transform_1, window_bounds = array<i64: 3>}, {transform_indices = @transform_2, window_bounds = array<i64: 1, 3, 2, 128>}, {transform_indices = @transform_3, window_bounds = array<i64: 1, 3, 2, 128>}]} {
    %c0 = arith.constant 0 : index
    %c0_0 = arith.constant 0 : index
    %c0_1 = arith.constant 0 : index
    %c0_2 = arith.constant 0 : index
    %0 = vector.load %arg4[%c0, %c0_0, %c0_1, %c0_2] : memref<1x3x2x128xf32, #tpu.memory_space<vmem>>, vector<1x1x2x128xf32>
    %1 = vector.shape_cast %0 : vector<1x1x2x128xf32> to vector<2x128xf32>
    %c0_3 = arith.constant 0 : index
    %2 = memref.load %arg2[%c0_3] : memref<3xf32, #tpu.memory_space<smem>>
    %3 = vector.broadcast %2 : f32 to vector<2x128xf32>
    %4 = arith.mulf %1, %3 : vector<2x128xf32>
    %c0_4 = arith.constant 0 : index
    %5 = memref.load %arg3[%c0_4] : memref<3xf32, #tpu.memory_space<smem>>
    %6 = vector.broadcast %5 : f32 to vector<2x128xf32>
    %7 = arith.addf %4, %6 : vector<2x128xf32>
    %c0_5 = arith.constant 0 : index
    %c0_6 = arith.constant 0 : index
    %c0_7 = arith.constant 0 : index
    %c0_8 = arith.constant 0 : index
    %8 = vector.load %arg5[%c0_5, %c0_6, %c0_7, %c0_8] : memref<1x3x2x128xf32, #tpu.memory_space<vmem>>, vector<1x1x2x128xf32>
    %9 = vector.shape_cast %8 : vector<1x1x2x128xf32> to vector<2x128xf32>
    %10 = vector.shape_cast %7 : vector<2x128xf32> to vector<1x1x2x128xf32>
    tpu.vector_store %arg5[%c0_5, %c0_6, %c0_7, %c0_8], %10 {strides = array<i32>} : memref<1x3x2x128xf32, #tpu.memory_space<vmem>>, vector<1x1x2x128xf32>,
    %c0_9 = arith.constant 0 : index
    %c1 = arith.constant 1 : index
    %c0_10 = arith.constant 0 : index
    %c0_11 = arith.constant 0 : index
    %11 = vector.load %arg4[%c0_9, %c1, %c0_10, %c0_11] : memref<1x3x2x128xf32, #tpu.memory_space<vmem>>, vector<1x1x2x128xf32>
    %12 = vector.shape_cast %11 : vector<1x1x2x128xf32> to vector<2x128xf32>
    %c1_12 = arith.constant 1 : index
    %13 = memref.load %arg2[%c1_12] : memref<3xf32, #tpu.memory_space<smem>>
    %14 = vector.broadcast %13 : f32 to vector<2x128xf32>
    %15 = arith.mulf %12, %14 : vector<2x128xf32>
    %c1_13 = arith.constant 1 : index
    %16 = memref.load %arg3[%c1_13] : memref<3xf32, #tpu.memory_space<smem>>
    %17 = vector.broadcast %16 : f32 to vector<2x128xf32>
    %18 = arith.addf %15, %17 : vector<2x128xf32>
    %c0_14 = arith.constant 0 : index
    %c1_15 = arith.constant 1 : index
    %c0_16 = arith.constant 0 : index
    %c0_17 = arith.constant 0 : index
    %19 = vector.load %arg5[%c0_14, %c1_15, %c0_16, %c0_17] : memref<1x3x2x128xf32, #tpu.memory_space<vmem>>, vector<1x1x2x128xf32>
    %20 = vector.shape_cast %19 : vector<1x1x2x128xf32> to vector<2x128xf32>
    %21 = vector.shape_cast %18 : vector<2x128xf32> to vector<1x1x2x128xf32>
    tpu.vector_store %arg5[%c0_14, %c1_15, %c0_16, %c0_17], %21 {strides = array<i32>} : memref<1x3x2x128xf32, #tpu.memory_space<vmem>>, vector<1x1x2x128xf32>,
    %c0_18 = arith.constant 0 : index
    %c2 = arith.constant 2 : index
    %c0_19 = arith.constant 0 : index
    %c0_20 = arith.constant 0 : index
    %22 = vector.load %arg4[%c0_18, %c2, %c0_19, %c0_20] : memref<1x3x2x128xf32, #tpu.memory_space<vmem>>, vector<1x1x2x128xf32>
    %23 = vector.shape_cast %22 : vector<1x1x2x128xf32> to vector<2x128xf32>
    %c2_21 = arith.constant 2 : index
    %24 = memref.load %arg2[%c2_21] : memref<3xf32, #tpu.memory_space<smem>>
    %25 = vector.broadcast %24 : f32 to vector<2x128xf32>
    %26 = arith.mulf %23, %25 : vector<2x128xf32>
    %c2_22 = arith.constant 2 : index
    %27 = memref.load %arg3[%c2_22] : memref<3xf32, #tpu.memory_space<smem>>
    %28 = vector.broadcast %27 : f32 to vector<2x128xf32>
    %29 = arith.addf %26, %28 : vector<2x128xf32>
    %c0_23 = arith.constant 0 : index
    %c2_24 = arith.constant 2 : index
    %c0_25 = arith.constant 0 : index
    %c0_26 = arith.constant 0 : index
    %30 = vector.load %arg5[%c0_23, %c2_24, %c0_25, %c0_26] : memref<1x3x2x128xf32, #tpu.memory_space<vmem>>, vector<1x1x2x128xf32>
    %31 = vector.shape_cast %30 : vector<1x1x2x128xf32> to vector<2x128xf32>
    %32 = vector.shape_cast %29 : vector<2x128xf32> to vector<1x1x2x128xf32>
    tpu.vector_store %arg5[%c0_23, %c2_24, %c0_25, %c0_26], %32 {strides = array<i32>} : memref<1x3x2x128xf32, #tpu.memory_space<vmem>>, vector<1x1x2x128xf32>,
    return
  }
  func.func @transform_0(%arg0: i32, %arg1: i32) -> i32 {
    %c0_i32 = arith.constant 0 : i32
    %c0_i32_0 = arith.constant 0 : i32
    return %c0_i32 : i32
  }
  func.func @transform_1(%arg0: i32, %arg1: i32) -> i32 {
    %c0_i32 = arith.constant 0 : i32
    %c0_i32_0 = arith.constant 0 : i32
    return %c0_i32 : i32
  }
  func.func @transform_2(%arg0: i32, %arg1: i32) -> (i32, i32, i32, i32) {
    %c0_i32 = arith.constant 0 : i32
    %c0_i32_0 = arith.constant 0 : i32
    %c0_i32_1 = arith.constant 0 : i32
    return %arg0, %c0_i32, %arg1, %c0_i32_0 : i32, i32, i32, i32
  }
  func.func @transform_3(%arg0: i32, %arg1: i32) -> (i32, i32, i32, i32) {
    %c0_i32 = arith.constant 0 : i32
    %c0_i32_0 = arith.constant 0 : i32
    %c0_i32_1 = arith.constant 0 : i32
    return %arg0, %c0_i32, %arg1, %c0_i32_0 : i32, i32, i32, i32
  }
}

</mosaic_0001>

<bundles_post_ra>
// kernel: batchnorm3d.2
= control target key start
LH: loop header
LB: loop body
LE: loop exit
PB: predicated region body
PF: predicated region fallthrough
CT: control target
= control target key end

     0   :  { %s352_s9 = smov 0   ;;  %s354_s10 = smov 0   ;;  %s430_s0 = inlined_call_operand.vmem [shape: f32[2,3,2,128], index: 0, kind: input, shape index: {}]   ;;  %s431_s1 = inlined_call_operand.vmem [shape: f32[3,128], index: 1, kind: output, shape index: {0}]   ;;  %s432_s2 = inlined_call_operand.vmem [shape: f32[3,128], index: 2, kind: output, shape index: {1}]  }
   0x1   :  { %s356_s11 = smov 0  }
   0x2 LB: > { %s25_s12 = sadd.s32 1, %s330_s10  ;;  %p278_p0 = scmp.ge.s32.totalorder %s334_s11, 1  ;;  %s334_s11 = sphi %s356_s11, %s13_s11   ;;  %s330_s10 = sphi %s354_s10, %s434_s10   ;;  %s326_s9 = sphi %s352_s9, %s433_s9  }
   0x3   : > { %p27_p1 = scmp.ge.s32.totalorder %s25_s12, 2  ;;  %p122_p2 = scmp.lt.s32.totalorder %s334_s11, 3 }
   0x5   : > { %s436_s12 = smov (%p27_p1, %s25_s12), 0  ;;  %p123_p3 = pnand %p278_p0, %p122_p2 }
   0x6   : > { %p142_p4 = scmp.lt.s32.totalorder (!%p123_p3), %s326_s9, 1  ;;  %p150_p5 = scmp.eq.s32.totalorder (!%p123_p3), %s326_s9, 0 }
   0x7   : > { %126 = sbr.rel (%p123_p3) target bundleno = 43 (0x2b), region = 24 }
   0xe   : > { %s438_s9 = smov (!%p142_p4, %s326_s9), 1  ;;  %155 = sbr.rel (!%p150_p5) target bundleno = 21 (0x15), region = 28 }
   0xf   : > { %s286_s13 = smul.u32 6, %s438_s9  ;;  %v336_v0 = vmov (%p150_p5), 0.0  }
  0x10   : > { %156 = vst [vmem:[%s431_s1] sm:$0x7] (%p150_p5), %v336_v0  ;;  %157 = vst [vmem:[%s432_s2] sm:$0x7] (%p150_p5), %v336_v0 }
  0x11   : > { %s149_s16 = scalar_lea.vmem %s430_s0, %s286_s13 }
  0x15 PF: > { %v158_v1 = vld [vmem:[%s149_s16] sm:$0x3]  ;;  %vm160_vm0 = vcmask 1041408   ;;  %v281_v4 = vld [vmem:[%s149_s16 + $0x2] sm:$0x3] }
  0x16   : > { %v161_v2 = vsel %vm160_vm0, %v158_v1, 0.0  ;;  %v171_v3 = vmul.f32 %v158_v1, %v158_v1  ;;  %v184_v6 = vsel %vm160_vm0, %v281_v4, 0.0  ;;  %v194_v7 = vmul.f32 %v281_v4, %v281_v4  ;;  %v282_v10 = vld [vmem:[%s149_s16 + $0x4] sm:$0x3] }
  0x17   : > { %v162_v5 = vrot.slane %v161_v2, 4  ;;  %v185_v9 = vrot.slane %v184_v6, 4  ;;  %v207_v14 = vsel %vm160_vm0, %v282_v10, 0.0  ;;  %v217_v18 = vmul.f32 %v282_v10, %v282_v10  ;;  %v159_v34 = vld [vmem:[%s431_s1] sm:$0x1] }
  0x18   : > { %v172_v8 = vsel %vm160_vm0, %v171_v3, 0.0  ;;  %v195_v13 = vsel %vm160_vm0, %v194_v7, 0.0  ;;  %v208_v17 = vrot.slane %v207_v14, 4  ;;  %v183_v40 = vld [vmem:[%s431_s1 + $0x1] sm:$0x1] }
  0x19   : > { %v163_v11 = vadd.f32 %v162_v5, %v161_v2  ;;  %v173_v12 = vrot.slane %v172_v8, 4  ;;  %v186_v15 = vadd.f32 %v185_v9, %v184_v6  ;;  %v196_v16 = vrot.slane %v195_v13, 4  ;;  %v170_v42 = vld [vmem:[%s432_s2] sm:$0x1]  ;;  %v193_v48 = vld [vmem:[%s432_s2 + $0x1] sm:$0x1] }
  0x1a   : > { %v209_v23 = vadd.f32 %v208_v17, %v207_v14  ;;  %v218_v24 = vsel %vm160_vm0, %v217_v18, 0.0  ;;  %v206_v49 = vld [vmem:[%s431_s1 + $0x2] sm:$0x1] }
  0x1b   : > { %v164_v19 = vrot.slane %v163_v11, 2  ;;  %v174_v20 = vadd.f32 %v173_v12, %v172_v8  ;;  %v187_v21 = vrot.slane %v186_v15, 2  ;;  %v197_v22 = vadd.f32 %v196_v16, %v195_v13  ;;  %v216_v58 = vld [vmem:[%s432_s2 + $0x2] sm:$0x1] }
  0x1c   : > { %v219_v27 = vrot.slane %v218_v24, 4  ;;  %v210_v30 = vrot.slane %v209_v23, 2 }
  0x1d   : > { %v165_v25 = vadd.f32 %v164_v19, %v163_v11  ;;  %v175_v26 = vrot.slane %v174_v20, 2  ;;  %v188_v28 = vadd.f32 %v187_v21, %v186_v15  ;;  %v198_v29 = vrot.slane %v197_v22, 2 }
  0x1e   : > { %v220_v33 = vadd.f32 %v219_v27, %v218_v24  ;;  %v211_v37 = vadd.f32 %v210_v30, %v209_v23 }
  0x1f   : > { %v166_v31 = vrot.slane %v165_v25, 1  ;;  %v176_v32 = vadd.f32 %v175_v26, %v174_v20  ;;  %v189_v35 = vrot.slane %v188_v28, 1  ;;  %v199_v36 = vadd.f32 %v198_v29, %v197_v22 }
  0x20   : > { %v221_v41 = vrot.slane %v220_v33, 2  ;;  %v212_v45 = vrot.slane %v211_v37, 1 }
  0x21   : > { %v167_v38 = vadd.f32 %v166_v31, %v165_v25  ;;  %v177_v39 = vrot.slane %v176_v32, 1  ;;  %v190_v43 = vadd.f32 %v189_v35, %v188_v28  ;;  %v200_v44 = vrot.slane %v199_v36, 1 }
  0x22   : > { %v222_v50 = vadd.f32 %v221_v41, %v220_v33  ;;  %v213_v53 = vadd.f32 %v212_v45, %v211_v37 }
  0x23   : > { %v168_v46 = vadd.f32 %v167_v38, %v159_v34  ;;  %v178_v47 = vadd.f32 %v177_v39, %v176_v32  ;;  %v191_v51 = vadd.f32 %v190_v43, %v183_v40  ;;  %v201_v52 = vadd.f32 %v200_v44, %v199_v36 }
  0x24   : > { %v223_v55 = vrot.slane %v222_v50, 1  ;;  %v214_v57 = vadd.f32 %v213_v53, %v206_v49 }
  0x25   : > { %169 = vst [vmem:[%s431_s1] sm:$0x1] %v168_v46  ;;  %v179_v54 = vadd.f32 %v178_v47, %v170_v42  ;;  %192 = vst [vmem:[%s431_s1 + $0x1] sm:$0x1] %v191_v51  ;;  %v202_v56 = vadd.f32 %v201_v52, %v193_v48 }
  0x26   : > { %v224_v59 = vadd.f32 %v223_v55, %v222_v50  ;;  %215 = vst [vmem:[%s431_s1 + $0x2] sm:$0x1] %v214_v57 }
  0x27   : > { %180 = vst [vmem:[%s432_s2] sm:$0x1] %v179_v54  ;;  %203 = vst [vmem:[%s432_s2 + $0x1] sm:$0x1] %v202_v56 }
  0x28   : > { %v225_v60 = vadd.f32 %v224_v59, %v216_v58 }
  0x2a   : > { %226 = vst [vmem:[%s432_s2 + $0x2] sm:$0x1] %v225_v60 }
  0x2b PF: > { %s13_s11 = sadd.s32 1, %s334_s11   ;;  %s433_s9 = smov %s330_s10 }
  0x2c   : > { %p10_p6 = scmp.ge.s32.totalorder %s13_s11, 4   ;;  %s434_s10 = smov %s436_s12 }
  0x2e   :  { %12 = sbr.rel (!%p10_p6) target bundleno = 2 (0x2), region = 64 }

// kernel: batchnorm3d.3
= control target key start
LH: loop header
LB: loop body
LE: loop exit
PB: predicated region body
PF: predicated region fallthrough
CT: control target
= control target key end

     0   :  { %8 = vsyncpa [#allocation3], 0  ;;  %s590_s0 = inlined_call_operand.vmem [shape: f32[3], index: 0, kind: input, shape index: {}]   ;;  %s591_s1 = inlined_call_operand.vmem [shape: f32[3], index: 1, kind: input, shape index: {}]   ;;  %s592_s2 = inlined_call_operand.vmem [shape: f32[2,3,2,128], index: 2, kind: input, shape index: {}]   ;;  %s593_s3 = inlined_call_operand.vmem [shape: f32[2,3,2,128], index: 3, kind: output, shape index: {}]  }
   0x1   :  { %9 = vsyncpa [#allocation5], 0  ;;  %s514_s12 = smov 0   ;;  %s516_s13 = smov 0  }
   0x2   :  { %s518_s14 = smov 0  }
   0x3 LB: > { %s363_s15 = sadd.s32 4294967295, %s490_s14   ;;  %s27_s16 = sadd.s32 1, %s486_s13  ;;  %s490_s14 = sphi %s518_s14, %s15_s14   ;;  %s486_s13 = sphi %s516_s13, %s603_s13   ;;  %s482_s12 = sphi %s514_s12, %s602_s12  }
   0x4   : > { %p29_p0 = scmp.ge.s32.totalorder %s27_s16, 2  ;;  %p365_p1 = scmp.ge.s32.totalorder %s490_s14, 1 }
   0x5   : > { %p130_p2 = scmp.lt.s32.totalorder %s490_s14, 3  ;;  %p539_p4 = scmp.eq.s32.totalorder %s363_s15, 0 }
   0x6   : > { %s605_s16 = smov (%p29_p0, %s27_s16), 0  ;;  %s143_s21 = sshll.u32 %s590_s0, 4  ;;  %s144_s21 = int_to_ptr.vmem [resolvable:$true] %s143_s21 }
   0x7   : > { %p535_p3 = pnand %p365_p1, %p130_p2  ;;  %s154_s24 = sshll.u32 %s591_s1, 4  ;;  %s155_s24 = int_to_ptr.vmem [resolvable:$true] %s154_s24 }
   0x8   : > { %s598_s18 = scalar_select %p539_p4, 1, 0 }
   0x9   : > { %s597_s17 = scalar_select %p535_p3, 1, 0 }
   0xa   : > { %p393_p5 = pneg %p535_p3  ;;  %s430_s26 = scalar_lea.vmem %s144_s21, 16 }
   0xb   : > { %p431_p7 = scmp.ne.s32.totalorder %s144_s21, %s430_s26  ;;  %p438_p11 = scmp.lt.s32.totalorder %s144_s21, %s144_s21 }
   0xc   : > { %p553_p6 = pnand %p539_p4, %p393_p5  ;;  %p439_p12 = scmp.lt.s32.totalorder %s430_s26, %s430_s26 }
   0xe   : > { %p432_p8 = pneg %p553_p6  ;;  %p440_p13 = por %p439_p12, %p438_p11 }
  0x10   : > { %p433_p9 = pnand %p432_p8, %p431_p7 }
  0x12   : > { %p434_p10 = pneg %p433_p9 }
  0x14   : > { %p441_p0 = pnand %p440_p13, %p434_p10 }
  0x16   : > { %444 = shalt.err (!%p441_p0)
}
  0x17   : > { %s492_s27 = smov [#allocation2]   ;;  %s445_s28 = scalar_lea.vmem %s155_s24, 16 }
  0x18   : > { %396 = dma.vmem_to_smem (!%p553_p6), %s144_s21, 16, %s492_s27, [#allocation3]  }
  0x19   : > { %p446_p1 = scmp.ne.s32.totalorder %s155_s24, %s445_s28  ;;  %p453_p4 = scmp.lt.s32.totalorder %s155_s24, %s155_s24 }
  0x1a   : > { %p454_p3 = scmp.lt.s32.totalorder %s445_s28, %s445_s28 }
  0x1b   : > { %p448_p2 = pnand %p446_p1, %p432_p8 }
  0x1c   : > { %p455_p7 = por %p454_p3, %p453_p4 }
  0x1d   : > { %p449_p5 = pneg %p448_p2 }
  0x1f   : > { %p456_p9 = pnand %p455_p7, %p449_p5 }
  0x21   : > { %459 = shalt.err (!%p456_p9)
}
  0x22   : > { %s493_s29 = smov [#allocation4]   ;;  %p600_p10 = scmp.ne.s32.totalorder %s597_s17, 0 }
  0x23   : > { %399 = dma.vmem_to_smem (!%p553_p6), %s155_s24, 16, %s493_s29, [#allocation5]  }
  0x24   : > { %178 = sbr.rel (%p600_p10) target bundleno = 63 (0x3f), region = 32  ;;  %p601_p11 = scmp.ne.s32.totalorder (!%p600_p10), %s598_s18, 0 }
  0x2b   : > { %473 = dma.done.wait (%p601_p11), [#allocation3], 16  }
  0x2c   : > { %475 = vsyncadd (%p601_p11), [#allocation3], 4294967280 }
  0x2d   : > { %477 = dma.done.wait (%p601_p11), [#allocation5], 16  }
  0x2e   : > { %479 = vsyncadd (%p601_p11), [#allocation5], 4294967280 }
  0x2f   : > { %188 = sfence }
  0x30   : > { %p213_p3 = scmp.lt.s32.totalorder %s482_s12, 1  ;;  %s230_s30 = sld [smem:[#allocation2]] }
  0x31   : > { %s233_s4 = sld [smem:[#allocation4]]  ;;  %s375_s5 = sld [smem:[#allocation2 + $0x1]] }
  0x32   : > { %s607_s12 = smov (!%p213_p3, %s482_s12), 1  ;;  %s376_s6 = sld [smem:[#allocation4 + $0x1]] }
  0x33   : > { %s379_s7 = sld [smem:[#allocation2 + $0x2]]  ;;  %s384_s8 = smul.u32 6, %s607_s12 }
  0x34   : > { %s380_s9 = sld [smem:[#allocation4 + $0x2]] }
  0x35   : > { %s220_s15 = scalar_lea.vmem %s592_s2, %s384_s8  ;;  %s228_s19 = scalar_lea.vmem %s593_s3, %s384_s8 }
  0x36   : > { %v231_v0 = vstv %s230_s30  ;;  %v229_v1 = vld [vmem:[%s220_s15] sm:$0x3]  ;;  %v374_v3 = vld [vmem:[%s220_s15 + $0x2] sm:$0x3]  ;;  %v378_v7 = vld [vmem:[%s220_s15 + $0x4] sm:$0x3] }
  0x37   : > { %v234_v2 = vstv %s233_s4  ;;  %v240_v4 = vstv %s375_s5  ;;  %v232_v5 = vmul.f32 %v231_v0, %v229_v1 }
  0x38   : > { %v241_v6 = vmul.f32 %v374_v3, %v240_v4  ;;  %v243_v8 = vstv %s376_s6 }
  0x39   : > { %v250_v9 = vstv %s379_s7  ;;  %v235_v10 = vadd.f32 %v234_v2, %v232_v5 }
  0x3a   : > { %v244_v11 = vadd.f32 %v243_v8, %v241_v6  ;;  %v251_v12 = vmul.f32 %v378_v7, %v250_v9  ;;  %v253_v13 = vstv %s380_s9 }
  0x3b   : > { %236 = vst [vmem:[%s228_s19] sm:$0x3] %v235_v10 }
  0x3c   : > { %377 = vst [vmem:[%s228_s19 + $0x2] sm:$0x3] %v244_v11  ;;  %v254_v14 = vadd.f32 %v253_v13, %v251_v12 }
  0x3e   : > { %381 = vst [vmem:[%s228_s19 + $0x4] sm:$0x3] %v254_v14 }
  0x3f PF: > { %s15_s14 = sadd.s32 1, %s490_s14   ;;  %s602_s12 = smov %s486_s13 }
  0x40   : > { %p12_p4 = scmp.ge.s32.totalorder %s15_s14, 4   ;;  %s603_s13 = smov %s605_s16 }
  0x42   :  { %14 = sbr.rel (!%p12_p4) target bundleno = 3 (0x3), region = 75 }
  0x49   :  { %284 = vsyncpa [#allocation3], 1 }
  0x4a   :  { %286 = vsyncpa [#allocation3 + $0x1], 1 }
  0x4b   :  { %287 = vsyncpa [#allocation5], 1 }

</bundles_post_ra>
